<compile_context>
chip_gen: v7x
topology: tpu7x:2x2x1
jax: 0.10.0
libtpu: 0.0.40
codegen_flags: <defaults>
</compile_context>

<pallas_src>
import functools

import jax
import jax.numpy as jnp
from jax.experimental import pallas as pl
from jax.experimental.pallas import tpu as pltpu

NUM_LAYERS = 2        # depth of the "middle" ModuleList
INPUT_SIZE = 32       # flattened input size (x.view(-1) must have this many elements)
HIDDEN = 5            # Linear(input_size, 5) ... Linear(5, 5) ...
OUT = 2               # Linear(5, 2)

HP = 8                # lane width of the single-sample param slab / output
LANES = 128           # lane-dense width for the batched output slab
P_ROWS = 40           # 32 weight rows + bias row, rounded up to a sublane multiple
B_ROW = INPUT_SIZE    # row index of the folded bias inside the slab


# --------------------------------------------------------------------------
# One-time parameter folding + packing (runs at init, NOT on the call path).
# Weights are stored [in_features, out_features] so every stage is h @ W + b.
# --------------------------------------------------------------------------
def fold_params(w1, b1, wms, bms, wo, bo):
    """Collapse the activation-free chain into one (32, 2) affine map."""
    w = w1.astype(jnp.float32)                 # (32, 5)
    b = b1.astype(jnp.float32)                 # (5,)
    for l in range(NUM_LAYERS):
        b = b @ wms[l].astype(jnp.float32) + bms[l].astype(jnp.float32)
        w = w @ wms[l].astype(jnp.float32)
    b = b @ wo.astype(jnp.float32) + bo.astype(jnp.float32)
    w = w @ wo.astype(jnp.float32)
    return w, b                                # (32, 2), (2,)


def pack_folded(w_fold, b_fold, lanes):
    """Pack folded weight + bias into one (P_ROWS, lanes) f32 slab.
    Rows [0, 32): W_fold (first OUT lanes).  Row 32: b_fold."""
    p = jnp.zeros((P_ROWS, lanes), jnp.float32)
    p = p.at[:INPUT_SIZE, :OUT].set(w_fold)
    p = p.at[B_ROW, :OUT].set(b_fold)
    return p


# --------------------------------------------------------------------------
# Kernel: one matmul + bias.  Works for both the (1, 32) single-sample call
# and the (TM, 32) batched tiles (shapes come from the refs).
# --------------------------------------------------------------------------
def folded_kernel(x_ref, p_ref, out_ref):
    w = p_ref[:INPUT_SIZE, :]                  # (32, lanes)
    b = p_ref[B_ROW:B_ROW + 1, :]              # (1, lanes)
    out_ref[...] = jnp.dot(x_ref[...], w,
                           preferred_element_type=jnp.float32) + b


# --------------------------------------------------------------------------
# Single-sample forward (matches PyTorch test_net.forward semantics exactly:
# x.view(-1) -> (2,) output).
# --------------------------------------------------------------------------
@jax.jit
def test_net_forward(x, packed_params):
    xv = x.reshape(1, INPUT_SIZE).astype(jnp.float32)      # x.view(-1), as (1, 32)
    out = pl.pallas_call(
        folded_kernel,
        out_shape=jax.ShapeDtypeStruct((1, HP), jnp.float32),
        in_specs=[
            pl.BlockSpec(memory_space=pltpu.MemorySpace.VMEM),   # x (1 DMA)
            pl.BlockSpec(memory_space=pltpu.MemorySpace.VMEM),   # packed params (1 DMA)
        ],
        out_specs=pl.BlockSpec(memory_space=pltpu.MemorySpace.VMEM),
    )(xv, packed_params)
    return out[0, :OUT]


# --------------------------------------------------------------------------
# Batched forward: x (B, 32) -> out (B, 2).  Grid over 256-row batch tiles,
# params untiled, lane-dense (TM, 128) output slab sliced in the wrapper.
# --------------------------------------------------------------------------
@functools.partial(jax.jit, static_argnames=("tm",))
def test_net_forward_batched(xb, packed_params_lane, tm=256):
    B = xb.shape[0]
    xb = xb.reshape(B, INPUT_SIZE).astype(jnp.float32)
    bp = pl.cdiv(B, tm) * tm
    if bp != B:
        xb = jnp.pad(xb, ((0, bp - B), (0, 0)))
    out = pl.pallas_call(
        folded_kernel,
        out_shape=jax.ShapeDtypeStruct((bp, LANES), jnp.float32),
        grid=(bp // tm,),
        in_specs=[
            pl.BlockSpec((tm, INPUT_SIZE), lambda i: (i, 0)),      # batch tile
            pl.BlockSpec((P_ROWS, LANES), lambda i: (0, 0)),       # params (resident)
        ],
        out_specs=pl.BlockSpec((tm, LANES), lambda i: (i, 0)),     # lane-dense output
        compiler_params=pltpu.CompilerParams(
            dimension_semantics=("parallel",)),                    # v7x: 2 TCs
    )(xb, packed_params_lane)
    return out[:B, :OUT]


# --------------------------------------------------------------------------
# Pure-JAX layer-by-layer reference (matches the PyTorch forward pass).
# --------------------------------------------------------------------------
def _reference(x, w1, b1, wms, bms, wo, bo):
    h = x.reshape(-1).astype(jnp.float32)
    h = h @ w1 + b1
    for l in range(NUM_LAYERS):
        h = h @ wms[l] + bms[l]
    return h @ wo + bo


def _reference_batched(xb, w1, b1, wms, bms, wo, bo):
    h = xb.reshape(xb.shape[0], -1).astype(jnp.float32)
    h = h @ w1 + b1
    for l in range(NUM_LAYERS):
        h = h @ wms[l] + bms[l]
    return h @ wo + bo


if __name__ == "__main__":
    key = jax.random.PRNGKey(0)
    ks = jax.random.split(key, 8)

    # Deterministic PyTorch-Linear-style uniform init; weights stored as
    # [in_features, out_features] (transposed vs. PyTorch) so each stage is
    # a plain h @ W + b.
    def uinit(k, shape, fan_in):
        bound = 1.0 / (fan_in ** 0.5)
        return jax.random.uniform(k, shape, jnp.float32, -bound, bound)

    w1 = uinit(ks[0], (INPUT_SIZE, HIDDEN), INPUT_SIZE)
    b1 = uinit(ks[1], (HIDDEN,), INPUT_SIZE)
    wms = uinit(ks[2], (NUM_LAYERS, HIDDEN, HIDDEN), HIDDEN)
    bms = uinit(ks[3], (NUM_LAYERS, HIDDEN), HIDDEN)
    wo = uinit(ks[4], (HIDDEN, OUT), HIDDEN)
    bo = uinit(ks[5], (OUT,), HIDDEN)

    # Fold + pack ONCE (hoisted out of the per-call path).
    w_fold, b_fold = fold_params(w1, b1, wms, bms, wo, bo)
    packed_single = jax.block_until_ready(pack_folded(w_fold, b_fold, HP))
    packed_batched = jax.block_until_ready(pack_folded(w_fold, b_fold, LANES))

    # --- single sample (module semantics: any shape flattening to 32) ---
    x = jax.random.normal(ks[6], (2, 4, 4), jnp.float32)   # 2*4*4 = 32
    out = jax.block_until_ready(test_net_forward(x, packed_single))
    ref = _reference(x, w1, b1, wms, bms, wo, bo)
    assert out.shape == (OUT,)
    assert jnp.allclose(out, ref, atol=1e-5, rtol=1e-5), (out, ref)

    # --- batched variant (throughput path) ---
    B = 512
    xb = jax.random.normal(ks[7], (B, INPUT_SIZE), jnp.float32)
    outb = jax.block_until_ready(test_net_forward_batched(xb, packed_batched))
    refb = _reference_batched(xb, w1, b1, wms, bms, wo, bo)
    assert outb.shape == (B, OUT)
    assert jnp.allclose(outb, refb, atol=1e-4, rtol=1e-4)

    print("KERNEL_OK")
</pallas_src>

<mosaic_0001>
module attributes {stable_mosaic.version = 11 : i64} {
  func.func @folded_kernel(%arg0: memref<1x32xf32, #tpu.memory_space<vmem>>, %arg1: memref<40x8xf32, #tpu.memory_space<vmem>>, %arg2: memref<1x8xf32, #tpu.memory_space<vmem>>) attributes {dimension_semantics = [], scalar_prefetch = 0 : i64, scratch_operands = 0 : i64, tpu.core_type = #tpu.core_type<tc>} {
    %c0 = arith.constant 0 : index
    %c0_0 = arith.constant 0 : index
    %0 = vector.load %arg1[%c0, %c0_0] : memref<40x8xf32, #tpu.memory_space<vmem>>, vector<32x8xf32>
    %c32 = arith.constant 32 : index
    %c0_1 = arith.constant 0 : index
    %1 = vector.load %arg1[%c32, %c0_1] : memref<40x8xf32, #tpu.memory_space<vmem>>, vector<1x8xf32>
    %c0_2 = arith.constant 0 : index
    %c0_3 = arith.constant 0 : index
    %2 = vector.load %arg0[%c0_2, %c0_3] : memref<1x32xf32, #tpu.memory_space<vmem>>, vector<1x32xf32>
    %cst = arith.constant dense<0.000000e+00> : vector<1x8xf32>
    %3 = tpu.matmul %2, %0, %cst {dimension_numbers = #tpu.dot_dimension_numbers<[1], [0], [0], [1], [0, 0, 1, 1], [], []>} : vector<1x32xf32>, vector<32x8xf32>, vector<1x8xf32> -> vector<1x8xf32>
    %4 = arith.addf %3, %1 : vector<1x8xf32>
    %c0_4 = arith.constant 0 : index
    %c0_5 = arith.constant 0 : index
    %5 = vector.load %arg2[%c0_4, %c0_5] : memref<1x8xf32, #tpu.memory_space<vmem>>, vector<1x8xf32>
    tpu.vector_store %arg2[%c0_4, %c0_5], %4 {strides = array<i32>} : memref<1x8xf32, #tpu.memory_space<vmem>>, vector<1x8xf32>,
    return
  }
}

</mosaic_0001>

<bundles_post_ra>
// kernel: test_net_forward.1
= control target key start
LH: loop header
LB: loop body
LE: loop exit
PB: predicated region body
PF: predicated region fallthrough
CT: control target
= control target key end

     0   :  { %v123_v0 = vmov 0.0|0.0   ;;  %vm124_vm0 = vmmov 0   ;;  %v125_v4 = vmov 0.0   ;;  %vm17_vm1 = vcmask 261120   ;;  %s162_s1 = inlined_call_operand.vmem [shape: f32[40,8], index: 1, kind: input, shape index: {}]   ;;  %s163_s0 = inlined_call_operand.vmem [shape: f32[1,32], index: 0, kind: input, shape index: {}]   ;;  %s164_s2 = inlined_call_operand.vmem [shape: f32[1,8], index: 2, kind: output, shape index: {}]  }
   0x1   :  { %114 = vmatprep.subr.bf16.mxu0 %v123_v0  ;;  %v11_v1 = vld [vmem:[%s162_s1] sm:$0xff]  ;;  %v12_v2 = vld [vmem:[%s162_s1 + $0x8] sm:$0xff]  ;;  %v13_v3 = vld [vmem:[%s162_s1 + $0x10] sm:$0xff]  ;;  %111 = vmatprep.mubr.msk.f32.mxu0 %vm124_vm0, %v125_v4  ;;  %vm91_vm2 = vcmask 57344  }
   0x2   :  { %v115_v5 = vpack.c.bf16 %v12_v2, %v11_v1  ;;  %v14_v6 = vld [vmem:[%s162_s1 + $0x18] sm:$0xff]  ;;  %v16_v8 = vld [vmem:[%s163_s0] sm:$0x1] }
   0x3   :  { %v118_v7 = vpack.c.bf16 %v14_v6, %v13_v3  ;;  %v15_v9 = vld [vmem:[%s162_s1 + $0x20] sm:$0x1] }
   0x4   :  { %116 = vmatpush3.bf16.msra.mxu0 %v115_v5 }
   0x5   :  { %117 = vmatprep.subr.bf16.mxu0 %v123_v0 }
   0x8   :  { %119 = vmatpush3.bf16.msra.mxu0 %v118_v7 }
   0xb   :  { %112 = vmatmul.mubr.msk.f32.vlgmr.msra.gmra.mrb[0].mxu0 %vm17_vm1, %v16_v8 }
  0xde   :  { %v87_v10 = vpop.f32.mrb[0].mxu0 }
  0xdf   :  { %v88_v11 = vadd.f32 %v87_v10, %v15_v9  ;;  %v113_v12 = vpop.f32.mrb[1].mxu0 }
  0xe1   :  { %92 = vst.msk [vmem:[%s164_s2] sm:$0x1] %vm91_vm2, %v88_v11 }

</bundles_post_ra>
